<compile_context>
chip_gen: v5e
topology: v5e:2x2
jax: 0.10.0
libtpu: 0.0.40
codegen_flags: <defaults>
</compile_context>

<pallas_src>
import jax
import jax.numpy as jnp
from jax.experimental import pallas as pl
from jax.experimental.pallas import tpu as pltpu

MAX_NORM = 1.0
_RENORM_EPS = 1e-7  # eps torch uses in Embedding max_norm renorm (reference only)


# ---------------------------------------------------------------------------
# Fast path: resident tables, batch-blocked grid, MXU one-hot gather.
# ---------------------------------------------------------------------------
def per_resident_kernel(u_idx_ref, v_idx_ref, u_tab_ref, v_tab_ref,
                        seg_ref, w_ref, o_ref):
    # u_idx_ref / v_idx_ref : VMEM [1, TB] int32   this step's batch tile
    # u_tab_ref             : VMEM [R*D, NU]       resident user table (feature-major)
    # v_tab_ref             : VMEM [R*D, NI]       resident item table (feature-major)
    # seg_ref               : VMEM [R, R*D]        segment-sum matrix (seg[r, r*D+d] = 1)
    # w_ref                 : VMEM [1, R]          Linear(R, 1, bias=False) weight
    # o_ref                 : VMEM [1, TB]         lane-dense logits tile for this step
    nu = u_tab_ref.shape[1]
    ni = v_tab_ref.shape[1]
    tb = o_ref.shape[1]

    # One-hot gather on the MXU: batch lives on lanes, features (R*D) on sublanes.
    oh_u = (jax.lax.broadcasted_iota(jnp.int32, (nu, tb), 0) == u_idx_ref[...]
            ).astype(jnp.float32)                                        # [NU, TB]
    oh_v = (jax.lax.broadcasted_iota(jnp.int32, (ni, tb), 0) == v_idx_ref[...]
            ).astype(jnp.float32)                                        # [NI, TB]

    ug = jnp.dot(u_tab_ref[...].astype(jnp.float32), oh_u,
                 preferred_element_type=jnp.float32)                     # [R*D, TB]
    vg = jnp.dot(v_tab_ref[...].astype(jnp.float32), oh_v,
                 preferred_element_type=jnp.float32)                     # [R*D, TB]

    # Per-relation reductions over D, all as one small segment-sum matmul each.
    seg = seg_ref[...]                                                   # [R, R*D]
    dots = jnp.dot(seg, ug * vg, preferred_element_type=jnp.float32)     # [R, TB]
    su = jnp.dot(seg, ug * ug, preferred_element_type=jnp.float32)       # [R, TB]
    sv = jnp.dot(seg, vg * vg, preferred_element_type=jnp.float32)       # [R, TB]

    # torch Embedding(max_norm=1): rows with L2 norm > 1 are rescaled to norm 1.
    # Apply the per-row constant scale to the scalar dot instead of the rows.
    scale_u = jnp.where(su > MAX_NORM * MAX_NORM, jax.lax.rsqrt(su), 1.0)
    scale_v = jnp.where(sv > MAX_NORM * MAX_NORM, jax.lax.rsqrt(sv), 1.0)

    # Linear(R, 1, bias=False) folded into a [1,R] x [R,TB] matmul, then sigmoid.
    pred = jnp.dot(w_ref[...], dots * scale_u * scale_v,
                   preferred_element_type=jnp.float32)                   # [1, TB]
    o_ref[...] = jax.nn.sigmoid(pred).astype(o_ref.dtype)                # unmasked vst


def _per_forward_resident(u_idx, v_idx, user_tables, item_tables, w_linear, block_b):
    B = u_idx.shape[0]
    NU, R, D = user_tables.shape
    NI = item_tables.shape[0]
    RD = R * D

    tb = block_b
    b_pad = pl.cdiv(B, tb) * tb

    # Pad batch to a multiple of TB (padded lanes compute garbage, sliced away).
    u_idx_p = jnp.zeros((1, b_pad), jnp.int32).at[0, :B].set(u_idx.astype(jnp.int32))
    v_idx_p = jnp.zeros((1, b_pad), jnp.int32).at[0, :B].set(v_idx.astype(jnp.int32))

    # One-time (init-time) layout transform: [N, R, D] -> [R*D, N] so the
    # one-hot matmul gather lands batch on lanes.  In a real system the tables
    # would be stored this way from the start.
    u_tab = jnp.transpose(user_tables.reshape(NU, RD))
    v_tab = jnp.transpose(item_tables.reshape(NI, RD))

    # Segment-sum matrix: seg[r, r*D + d] = 1.
    seg = (jnp.arange(R)[:, None] == (jnp.arange(RD)[None, :] // D)
           ).astype(jnp.float32)

    out = pl.pallas_call(
        per_resident_kernel,
        out_shape=jax.ShapeDtypeStruct((1, b_pad), jnp.float32),
        grid=(b_pad // tb,),
        in_specs=[
            pl.BlockSpec((1, tb), lambda b: (0, b)),      # u_idx tile
            pl.BlockSpec((1, tb), lambda b: (0, b)),      # v_idx tile
            pl.BlockSpec((RD, NU), lambda b: (0, 0)),     # resident user table
            pl.BlockSpec((RD, NI), lambda b: (0, 0)),     # resident item table
            pl.BlockSpec((R, RD), lambda b: (0, 0)),      # segment-sum matrix
            pl.BlockSpec((1, R), lambda b: (0, 0)),       # linear weight row
        ],
        out_specs=pl.BlockSpec((1, tb), lambda b: (0, b)),
        compiler_params=pltpu.CompilerParams(
            # Per-step output blocks are independent -> batch axis is parallel
            # (shards across the 2 TensorCores on v7x; harmless on v5e/v6e).
            dimension_semantics=("parallel",),
        ),
    )(u_idx_p, v_idx_p, u_tab, v_tab, seg, w_linear.astype(jnp.float32))
    return out[0, :B]


# ---------------------------------------------------------------------------
# Fallback path: per-element data-dependent BlockSpec row gather (tables too
# large to keep resident in VMEM).  Previously verified; gather streams now
# pipelined 3-deep.
# ---------------------------------------------------------------------------
def per_gather_kernel(u_idx_ref, v_idx_ref, u_ref, v_ref, w_ref, o_ref):
    # u_idx_ref / v_idx_ref : SMEM [B] int32 (scalar prefetch; used by index_maps)
    # u_ref, v_ref          : VMEM [1, R, D]  gathered rows for this batch element
    # w_ref                 : VMEM [R, 1]     linear weight (no bias)
    # o_ref                 : VMEM [1, B]     resident lane-dense logits block
    b = pl.program_id(0)

    u = u_ref[0].astype(jnp.float32)                # [R, D]
    v = v_ref[0].astype(jnp.float32)                # [R, D]

    dots = jnp.sum(u * v, axis=-1, keepdims=True)   # [R, 1]
    su = jnp.sum(u * u, axis=-1, keepdims=True)     # [R, 1]
    sv = jnp.sum(v * v, axis=-1, keepdims=True)     # [R, 1]

    scale_u = jnp.where(su > MAX_NORM * MAX_NORM, jax.lax.rsqrt(su), 1.0)
    scale_v = jnp.where(sv > MAX_NORM * MAX_NORM, jax.lax.rsqrt(sv), 1.0)

    pred = jnp.sum(dots * scale_u * scale_v * w_ref[...], axis=0, keepdims=True)
    logit = jax.nn.sigmoid(pred)

    @pl.when(b == 0)
    def _():
        o_ref[...] = jnp.zeros_like(o_ref)

    lane = jax.lax.broadcasted_iota(jnp.int32, o_ref.shape, 1)   # [1, B]
    o_ref[...] = jnp.where(lane == b, logit.astype(o_ref.dtype), o_ref[...])


def _per_forward_gather(u_idx, v_idx, user_tables, item_tables, w_linear):
    B = u_idx.shape[0]
    _, R, D = user_tables.shape
    w_col = jnp.transpose(w_linear)                 # (R, 1): no in-kernel transpose

    out = pl.pallas_call(
        per_gather_kernel,
        out_shape=jax.ShapeDtypeStruct((1, B), jnp.float32),
        grid_spec=pltpu.PrefetchScalarGridSpec(
            num_scalar_prefetch=2,                  # u_idx, v_idx -> SMEM
            grid=(B,),
            in_specs=[
                pl.BlockSpec((1, R, D), lambda b, u_i, v_i: (u_i[b], 0, 0),
                             pipeline_mode=pl.Buffered(3)),
                pl.BlockSpec((1, R, D), lambda b, u_i, v_i: (v_i[b], 0, 0),
                             pipeline_mode=pl.Buffered(3)),
                pl.BlockSpec((R, 1),    lambda b, u_i, v_i: (0, 0)),
            ],
            out_specs=pl.BlockSpec((1, B), lambda b, u_i, v_i: (0, 0)),
        ),
        compiler_params=pltpu.CompilerParams(
            dimension_semantics=("arbitrary",),     # output block shared across steps
        ),
    )(u_idx, v_idx, user_tables, item_tables, w_col)
    return out[0]


# ---------------------------------------------------------------------------
# Dispatch
# ---------------------------------------------------------------------------
def per_forward(u_idx, v_idx, user_tables, item_tables, w_linear, *,
                block_b=128, resident_table_budget_bytes=4 * 1024 * 1024):
    """Fused PER forward.

    user_tables : [NU, R, D]  per-user, per-relation embedding rows
    item_tables : [NI, R, D]
    w_linear    : [1, R]      torch Linear(R, 1, bias=False) weight
    u_idx, v_idx: [B] int32
    returns     : [B] f32 logits
    """
    NU, R, D = user_tables.shape
    NI = item_tables.shape[0]
    table_bytes = (NU + NI) * R * D * jnp.dtype(user_tables.dtype).itemsize
    # 4 MiB budget is safe on every chip's default scoped-VMEM limit even with
    # double-buffered resident blocks (v5e 16 MiB, v6e/v7x 32 MiB scoped).
    if table_bytes <= resident_table_budget_bytes:
        return _per_forward_resident(u_idx, v_idx, user_tables, item_tables,
                                     w_linear, block_b)
    return _per_forward_gather(u_idx, v_idx, user_tables, item_tables, w_linear)


def _reference(u_idx, v_idx, user_tables_rnd, item_tables_rnd, w_linear):
    # Pure-JAX reference with torch's exact max_norm formula.
    # user_tables_rnd / item_tables_rnd: [R, N, D]
    u = user_tables_rnd[:, u_idx, :]
    v = item_tables_rnd[:, v_idx, :]
    un = jnp.linalg.norm(u, axis=-1, keepdims=True)
    vn = jnp.linalg.norm(v, axis=-1, keepdims=True)
    u = u * jnp.where(un > MAX_NORM, MAX_NORM / (un + _RENORM_EPS), 1.0)
    v = v * jnp.where(vn > MAX_NORM, MAX_NORM / (vn + _RENORM_EPS), 1.0)
    dots = jnp.sum(u * v, axis=-1).T                # [B, R]
    return jax.nn.sigmoid(dots @ w_linear.T)[:, 0]


if __name__ == "__main__":
    # Synthetic, deterministic parameters (shapes implied by the module):
    #   R relations (meta-paths), per-relation user/item embedding tables of
    #   width n_dim, and a Linear(R, 1, bias=False) weight.
    R, NUM_USERS, NUM_ITEMS, D, B = 3, 20, 24, 32, 8

    key = jax.random.PRNGKey(0)
    k_u, k_i, k_w, k_uid, k_vid = jax.random.split(key, 5)

    # NMF factors are nonnegative; mimic that with uniform [0, 0.5) init.
    user_tables_rnd = jax.random.uniform(k_u, (R, NUM_USERS, D), jnp.float32, 0.0, 0.5)
    item_tables_rnd = jax.random.uniform(k_i, (R, NUM_ITEMS, D), jnp.float32, 0.0, 0.5)
    # Linear(R, 1, bias=False) default init: U(-1/sqrt(R), 1/sqrt(R))
    bound = 1.0 / (R ** 0.5)
    w_linear = jax.random.uniform(k_w, (1, R), jnp.float32, -bound, bound)

    u_idx = jax.random.randint(k_uid, (B,), 0, NUM_USERS, dtype=jnp.int32)
    v_idx = jax.random.randint(k_vid, (B,), 0, NUM_ITEMS, dtype=jnp.int32)

    # One-time (init-time) layout transform to the row-gather layout [N, R, D].
    user_tables = jnp.transpose(user_tables_rnd, (1, 0, 2))
    item_tables = jnp.transpose(item_tables_rnd, (1, 0, 2))

    out = per_forward(u_idx, v_idx, user_tables, item_tables, w_linear)
    out = jax.block_until_ready(out)

    ref = _reference(u_idx, v_idx, user_tables_rnd, item_tables_rnd, w_linear)
    assert out.shape == (B,)
    assert jnp.allclose(out, ref, atol=1e-5, rtol=1e-5)

    print("KERNEL_OK")
</pallas_src>

<mosaic_0001>
module attributes {stable_mosaic.version = 11 : i64} {
  func.func @per_resident_kernel(%arg0: i32, %arg1: memref<1x128xi32, #tpu.memory_space<vmem>>, %arg2: memref<1x128xi32, #tpu.memory_space<vmem>>, %arg3: memref<96x20xf32, #tpu.memory_space<vmem>>, %arg4: memref<96x24xf32, #tpu.memory_space<vmem>>, %arg5: memref<3x96xf32, #tpu.memory_space<vmem>>, %arg6: memref<1x3xf32, #tpu.memory_space<vmem>>, %arg7: memref<1x128xf32, #tpu.memory_space<vmem>>) attributes {dimension_semantics = [#tpu.dimension_semantics<parallel>], iteration_bounds = array<i64: 1>, scalar_prefetch = 0 : i64, scratch_operands = 0 : i64, tpu.core_type = #tpu.core_type<tc>, window_params = [{transform_indices = @transform_0, window_bounds = array<i64: 1, 128>}, {transform_indices = @transform_1, window_bounds = array<i64: 1, 128>}, {pipeline_mode = #tpu.pipeline_mode<synchronous>, transform_indices = @transform_2, window_bounds = array<i64: 96, 20>}, {pipeline_mode = #tpu.pipeline_mode<synchronous>, transform_indices = @transform_3, window_bounds = array<i64: 96, 24>}, {pipeline_mode = #tpu.pipeline_mode<synchronous>, transform_indices = @transform_4, window_bounds = array<i64: 3, 96>}, {pipeline_mode = #tpu.pipeline_mode<synchronous>, transform_indices = @transform_5, window_bounds = array<i64: 1, 3>}, {transform_indices = @transform_6, window_bounds = array<i64: 1, 128>}]} {
    %0 = tpu.iota {dimensions = array<i32: 0>} : vector<20x128xi32>
    %c0 = arith.constant 0 : index
    %c0_0 = arith.constant 0 : index
    %1 = vector.load %arg1[%c0, %c0_0] : memref<1x128xi32, #tpu.memory_space<vmem>>, vector<1x128xi32>
    %2 = vector.broadcast %1 : vector<1x128xi32> to vector<20x128xi32>
    %3 = arith.cmpi eq, %0, %2 : vector<20x128xi32>
    %4 = arith.extui %3 : vector<20x128xi1> to vector<20x128xi32>
    %5 = arith.sitofp %4 : vector<20x128xi32> to vector<20x128xf32>
    %6 = tpu.iota {dimensions = array<i32: 0>} : vector<24x128xi32>
    %c0_1 = arith.constant 0 : index
    %c0_2 = arith.constant 0 : index
    %7 = vector.load %arg2[%c0_1, %c0_2] : memref<1x128xi32, #tpu.memory_space<vmem>>, vector<1x128xi32>
    %8 = vector.broadcast %7 : vector<1x128xi32> to vector<24x128xi32>
    %9 = arith.cmpi eq, %6, %8 : vector<24x128xi32>
    %10 = arith.extui %9 : vector<24x128xi1> to vector<24x128xi32>
    %11 = arith.sitofp %10 : vector<24x128xi32> to vector<24x128xf32>
    %c0_3 = arith.constant 0 : index
    %c0_4 = arith.constant 0 : index
    %12 = vector.load %arg3[%c0_3, %c0_4] : memref<96x20xf32, #tpu.memory_space<vmem>>, vector<96x20xf32>
    %cst = arith.constant dense<0.000000e+00> : vector<96x128xf32>
    %13 = tpu.matmul %12, %5, %cst {dimension_numbers = #tpu.dot_dimension_numbers<[1], [0], [0], [1], [0, 0, 1, 1], [], []>} : vector<96x20xf32>, vector<20x128xf32>, vector<96x128xf32> -> vector<96x128xf32>
    %c0_5 = arith.constant 0 : index
    %c0_6 = arith.constant 0 : index
    %14 = vector.load %arg4[%c0_5, %c0_6] : memref<96x24xf32, #tpu.memory_space<vmem>>, vector<96x24xf32>
    %cst_7 = arith.constant dense<0.000000e+00> : vector<96x128xf32>
    %15 = tpu.matmul %14, %11, %cst_7 {dimension_numbers = #tpu.dot_dimension_numbers<[1], [0], [0], [1], [0, 0, 1, 1], [], []>} : vector<96x24xf32>, vector<24x128xf32>, vector<96x128xf32> -> vector<96x128xf32>
    %c0_8 = arith.constant 0 : index
    %c0_9 = arith.constant 0 : index
    %16 = vector.load %arg5[%c0_8, %c0_9] : memref<3x96xf32, #tpu.memory_space<vmem>>, vector<3x96xf32>
    %17 = arith.mulf %13, %15 : vector<96x128xf32>
    %cst_10 = arith.constant dense<0.000000e+00> : vector<3x128xf32>
    %18 = tpu.matmul %16, %17, %cst_10 {dimension_numbers = #tpu.dot_dimension_numbers<[1], [0], [0], [1], [0, 0, 1, 1], [], []>} : vector<3x96xf32>, vector<96x128xf32>, vector<3x128xf32> -> vector<3x128xf32>
    %19 = arith.mulf %13, %13 : vector<96x128xf32>
    %cst_11 = arith.constant dense<0.000000e+00> : vector<3x128xf32>
    %20 = tpu.matmul %16, %19, %cst_11 {dimension_numbers = #tpu.dot_dimension_numbers<[1], [0], [0], [1], [0, 0, 1, 1], [], []>} : vector<3x96xf32>, vector<96x128xf32>, vector<3x128xf32> -> vector<3x128xf32>
    %21 = arith.mulf %15, %15 : vector<96x128xf32>
    %cst_12 = arith.constant dense<0.000000e+00> : vector<3x128xf32>
    %22 = tpu.matmul %16, %21, %cst_12 {dimension_numbers = #tpu.dot_dimension_numbers<[1], [0], [0], [1], [0, 0, 1, 1], [], []>} : vector<3x96xf32>, vector<96x128xf32>, vector<3x128xf32> -> vector<3x128xf32>
    %cst_13 = arith.constant 1.000000e+00 : f32
    %23 = vector.broadcast %cst_13 : f32 to vector<3x128xf32>
    %24 = arith.cmpf ogt, %20, %23 : vector<3x128xf32>
    %25 = math.rsqrt %20 : vector<3x128xf32>
    %cst_14 = arith.constant 1.000000e+00 : f32
    %26 = vector.broadcast %cst_14 : f32 to vector<3x128xf32>
    %27 = arith.select %24, %25, %26 : vector<3x128xi1>, vector<3x128xf32>
    %cst_15 = arith.constant 1.000000e+00 : f32
    %28 = vector.broadcast %cst_15 : f32 to vector<3x128xf32>
    %29 = arith.cmpf ogt, %22, %28 : vector<3x128xf32>
    %30 = math.rsqrt %22 : vector<3x128xf32>
    %cst_16 = arith.constant 1.000000e+00 : f32
    %31 = vector.broadcast %cst_16 : f32 to vector<3x128xf32>
    %32 = arith.select %29, %30, %31 : vector<3x128xi1>, vector<3x128xf32>
    %c0_17 = arith.constant 0 : index
    %c0_18 = arith.constant 0 : index
    %33 = vector.load %arg6[%c0_17, %c0_18] : memref<1x3xf32, #tpu.memory_space<vmem>>, vector<1x3xf32>
    %34 = arith.mulf %18, %27 : vector<3x128xf32>
    %35 = arith.mulf %34, %32 : vector<3x128xf32>
    %cst_19 = arith.constant dense<0.000000e+00> : vector<1x128xf32>
    %36 = tpu.matmul %33, %35, %cst_19 {dimension_numbers = #tpu.dot_dimension_numbers<[1], [0], [0], [1], [0, 0, 1, 1], [], []>} : vector<1x3xf32>, vector<3x128xf32>, vector<1x128xf32> -> vector<1x128xf32>
    %37 = arith.negf %36 : vector<1x128xf32>
    %38 = math.exp %37 : vector<1x128xf32>
    %cst_20 = arith.constant 1.000000e+00 : f32
    %39 = vector.broadcast %cst_20 : f32 to vector<1x128xf32>
    %40 = arith.addf %39, %38 : vector<1x128xf32>
    %41 = arith.divf %39, %40 : vector<1x128xf32>
    %c0_21 = arith.constant 0 : index
    %c0_22 = arith.constant 0 : index
    %42 = vector.load %arg7[%c0_21, %c0_22] : memref<1x128xf32, #tpu.memory_space<vmem>>, vector<1x128xf32>
    tpu.vector_store %arg7[%c0_21, %c0_22], %41 {strides = array<i32>} : memref<1x128xf32, #tpu.memory_space<vmem>>, vector<1x128xf32>,
    return
  }
  func.func @transform_0(%arg0: i32) -> (i32, i32) {
    %c0_i32 = arith.constant 0 : i32
    %c0_i32_0 = arith.constant 0 : i32
    return %c0_i32, %arg0 : i32, i32
  }
  func.func @transform_1(%arg0: i32) -> (i32, i32) {
    %c0_i32 = arith.constant 0 : i32
    %c0_i32_0 = arith.constant 0 : i32
    return %c0_i32, %arg0 : i32, i32
  }
  func.func @transform_2(%arg0: i32) -> (i32, i32) {
    %c0_i32 = arith.constant 0 : i32
    %c0_i32_0 = arith.constant 0 : i32
    %c0_i32_1 = arith.constant 0 : i32
    return %c0_i32, %c0_i32_0 : i32, i32
  }
  func.func @transform_3(%arg0: i32) -> (i32, i32) {
    %c0_i32 = arith.constant 0 : i32
    %c0_i32_0 = arith.constant 0 : i32
    %c0_i32_1 = arith.constant 0 : i32
    return %c0_i32, %c0_i32_0 : i32, i32
  }
  func.func @transform_4(%arg0: i32) -> (i32, i32) {
    %c0_i32 = arith.constant 0 : i32
    %c0_i32_0 = arith.constant 0 : i32
    %c0_i32_1 = arith.constant 0 : i32
    return %c0_i32, %c0_i32_0 : i32, i32
  }
  func.func @transform_5(%arg0: i32) -> (i32, i32) {
    %c0_i32 = arith.constant 0 : i32
    %c0_i32_0 = arith.constant 0 : i32
    %c0_i32_1 = arith.constant 0 : i32
    return %c0_i32, %c0_i32_0 : i32, i32
  }
  func.func @transform_6(%arg0: i32) -> (i32, i32) {
    %c0_i32 = arith.constant 0 : i32
    %c0_i32_0 = arith.constant 0 : i32
    return %c0_i32, %arg0 : i32, i32
  }
}

</mosaic_0001>

<bundles_post_ra>
// kernel: tpu_custom_call.1
= control target key start
LH: loop header
LB: loop body
LE: loop exit
PB: predicated region body
PF: predicated region fallthrough
CT: control target
= control target key end

     0   :  { %v24_v0 = vlaneseq  ;;  %vm99_vm0 = vcmask 1043456   ;;  %v540_v6 = vmov 0.0   ;;  %v541_v8 = vmov 1.0   ;;  %s747_s0 = inlined_call_operand.vmem [shape: s32[1,128], index: 0, kind: input, shape index: {}]   ;;  %s748_s1 = inlined_call_operand.vmem [shape: s32[1,128], index: 1, kind: input, shape index: {}]   ;;  %s749_s2 = inlined_call_operand.vmem [shape: f32[96,20], index: 2, kind: input, shape index: {}]   ;;  %s750_s3 = inlined_call_operand.vmem [shape: f32[96,24], index: 3, kind: input, shape index: {}]   ;;  %s751_s4 = inlined_call_operand.vmem [shape: f32[3,96], index: 4, kind: input, shape index: {}]   ;;  %s752_s5 = inlined_call_operand.vmem [shape: f32[1,3], index: 5, kind: input, shape index: {}]   ;;  %s753_s6 = inlined_call_operand.hbm [shape: f32[1,128], index: 6, kind: output, shape index: {}]  }
   0x1   :  { %v504_v2 = vld [vmem:[%s747_s0] ss:$0 sm:$0xff] }
   0x2   :  { %v25_v1 = vshrl.u32 %v24_v0, 7  ;;  %v505_v3 = vld [vmem:[%s748_s1] ss:$0 sm:$0xff] }
   0x4   :  { %v27_v4 = vadd.s32 16, %v25_v1  ;;  %v26_v5 = vadd.s32 8, %v25_v1 }
   0x6   :  { %vm32_vm1 = vcmp.eq.s32.totalorder %v27_v4, %v504_v2  ;;  %vm43_vm2 = vcmp.eq.s32.totalorder %v27_v4, %v505_v3  ;;  %vm42_vm3 = vcmp.eq.s32.totalorder %v26_v5, %v505_v3  ;;  %vm31_vm4 = vcmp.eq.s32.totalorder %v26_v5, %v504_v2 }
   0x7   :  { %v452_v7 = vsel %vm32_vm1, 1.0, %v540_v6  ;;  %471 = vmatpush.msk.msra.mxu1 %vm43_vm2, %v541_v8 }
   0x8   :  { %11 = vsyncpa [#allocation3], 0  ;;  %456 = vmatpush.msk.msra.mxu0 %vm99_vm0, %v452_v7  ;;  %493 = vmatpush.msk.msra.mxu3 %vm99_vm0, %v452_v7  ;;  %vm41_vm5 = vcmp.eq.s32.totalorder %v25_v1, %v505_v3  ;;  %vm30_vm6 = vcmp.eq.s32.totalorder %v25_v1, %v504_v2  ;;  %v50_v9 = vld [vmem:[%s749_s2] sm:$0xff]  ;;  %vm62_vm7 = vcmask 162816   ;;  %v61_v10 = vld [vmem:[%s749_s2 + $0x58] sm:$0xff]  ;;  %vm168_vm8 = vcmask 195584  }
   0x9   :  { %472 = vmatpush.msk.msra.mxu1 %vm42_vm3, %v541_v8  ;;  %492 = vmatpush.msk.msra.mxu2 %vm99_vm0, %v452_v7  ;;  %v156_v11 = vld [vmem:[%s750_s3] sm:$0xff]  ;;  %v51_v13 = vld [vmem:[%s749_s2 + $0x8] sm:$0xff]  ;;  %v52_v17 = vld [vmem:[%s749_s2 + $0x10] sm:$0xff]  ;;  %vm271_vm9 = vcmask 785408   ;;  %s542_s22 = smov [#allocation2]   ;;  %s441_s0 = sshll.u32 %s753_s6, 4  ;;  %s442_s0 = int_to_ptr.hbm [resolvable:$true] %s441_s0 }
   0xa   :  { %457 = vmatpush.msk.msra.mxu0 %vm31_vm4, %v541_v8  ;;  %495 = vmatpush.msk.msra.mxu3 %vm31_vm4, %v541_v8  ;;  %v58_v12 = vld [vmem:[%s749_s2 + $0x40] sm:$0xff]  ;;  %v157_v15 = vld [vmem:[%s750_s3 + $0x8] sm:$0xff]  ;;  %v158_v19 = vld [vmem:[%s750_s3 + $0x10] sm:$0xff]  ;;  %s439_s23 = sshll.u32 %s542_s22, 4  ;;  %s440_s23 = int_to_ptr.vmem [resolvable:$true] %s439_s23 }
   0xb   :  { %473 = vmatpush.msk.msra.mxu1 %vm41_vm5, %v541_v8  ;;  %494 = vmatpush.msk.msra.mxu2 %vm31_vm4, %v541_v8  ;;  %v164_v14 = vld [vmem:[%s750_s3 + $0x40] sm:$0xff]  ;;  %v59_v16 = vld [vmem:[%s749_s2 + $0x48] sm:$0xff]  ;;  %v60_v20 = vld [vmem:[%s749_s2 + $0x50] sm:$0xff] }
   0xc   :  { %458 = vmatpush.msk.msra.mxu0 %vm30_vm6, %v541_v8  ;;  %497 = vmatpush.msk.msra.mxu3 %vm30_vm6, %v541_v8  ;;  %v165_v18 = vld [vmem:[%s750_s3 + $0x48] sm:$0xff]  ;;  %v53_v21 = vld [vmem:[%s749_s2 + $0x18] sm:$0xff]  ;;  %v166_v22 = vld [vmem:[%s750_s3 + $0x50] sm:$0xff] }
   0xd   :  { %459 = vmatmul.msk.f32.vlgmr.msra.gmra.mxu0 %vm62_vm7, %v50_v9  ;;  %470 = vmatmul.msk.f32.vlgmr.msra.gmra.mxu3 %vm62_vm7, %v61_v10  ;;  %v159_v23 = vld [vmem:[%s750_s3 + $0x18] sm:$0xff]  ;;  %v54_v24 = vld [vmem:[%s749_s2 + $0x20] sm:$0xff]  ;;  %v55_v27 = vld [vmem:[%s749_s2 + $0x28] sm:$0xff] }
   0xe   :  { %474 = vmatmul.msk.f32.vlgmr.msra.gmra.mxu1 %vm168_vm8, %v156_v11  ;;  %498 = vmatpush.msk.msrb.mxu3 %vm43_vm2, %v541_v8  ;;  %v167_v25 = vld [vmem:[%s750_s3 + $0x58] sm:$0xff]  ;;  %v160_v26 = vld [vmem:[%s750_s3 + $0x20] sm:$0xff]  ;;  %v161_v28 = vld [vmem:[%s750_s3 + $0x28] sm:$0xff]  ;;  %vm390_vm2 = vcmask 1042432  }
   0xf   :  { %496 = vmatpush.msk.msra.mxu2 %vm30_vm6, %v541_v8  ;;  %v56_v29 = vld [vmem:[%s749_s2 + $0x30] sm:$0xff]  ;;  %v57_v31 = vld [vmem:[%s749_s2 + $0x38] sm:$0xff] }
  0x10   :  { %499 = vmatpush.msk.msrb.mxu3 %vm42_vm3, %v541_v8  ;;  %467 = vmatmul.msk.f32.vlgmr.msra.gmra.mxu2 %vm62_vm7, %v58_v12  ;;  %v162_v30 = vld [vmem:[%s750_s3 + $0x30] sm:$0xff]  ;;  %v163_v32 = vld [vmem:[%s750_s3 + $0x38] sm:$0xff]  ;;  %vm386_vm3 = vcmask 23552  }
  0x12   :  { %500 = vmatpush.msk.msrb.mxu3 %vm41_vm5, %v541_v8 }
  0x15   :  { %460 = vmatmul.msk.f32.gmra.mxu0 %vm62_vm7, %v51_v13  ;;  %482 = vmatmul.msk.f32.vlgmr.msrb.gmra.mxu3 %vm168_vm8, %v164_v14 }
  0x16   :  { %475 = vmatmul.msk.f32.gmra.mxu1 %vm168_vm8, %v157_v15 }
  0x18   :  { %468 = vmatmul.msk.f32.gmra.mxu2 %vm62_vm7, %v59_v16 }
  0x1d   :  { %461 = vmatmul.msk.f32.gmra.mxu0 %vm62_vm7, %v52_v17  ;;  %483 = vmatmul.msk.f32.gmra.mxu3 %vm168_vm8, %v165_v18  ;;  %v258_v17 = vld [vmem:[%s751_s4] sm:$0x7] }
  0x1e   :  { %476 = vmatmul.msk.f32.gmra.mxu1 %vm168_vm8, %v158_v19 }
  0x20   :  { %469 = vmatmul.msk.f32.gmra.mxu2 %vm62_vm7, %v60_v20 }
  0x25   :  { %462 = vmatmul.msk.f32.gmra.mxu0 %vm62_vm7, %v53_v21  ;;  %484 = vmatmul.msk.f32.gmra.mxu3 %vm168_vm8, %v166_v22 }
  0x26   :  { %477 = vmatmul.msk.f32.gmra.mxu1 %vm168_vm8, %v159_v23 }
  0x2d   :  { %463 = vmatmul.msk.f32.gmra.mxu0 %vm62_vm7, %v54_v24  ;;  %485 = vmatmul.msk.f32.gmra.mxu3 %vm168_vm8, %v167_v25 }
  0x2e   :  { %478 = vmatmul.msk.f32.gmra.mxu1 %vm168_vm8, %v160_v26 }
  0x35   :  { %464 = vmatmul.msk.f32.gmra.mxu0 %vm62_vm7, %v55_v27 }
  0x36   :  { %479 = vmatmul.msk.f32.gmra.mxu1 %vm168_vm8, %v161_v28 }
  0x3d   :  { %465 = vmatmul.msk.f32.gmra.mxu0 %vm62_vm7, %v56_v29 }
  0x3e   :  { %480 = vmatmul.msk.f32.gmra.mxu1 %vm168_vm8, %v162_v30 }
  0x45   :  { %466 = vmatmul.msk.f32.gmra.mxu0 %vm62_vm7, %v57_v31 }
  0x46   :  { %481 = vmatmul.msk.f32.gmra.mxu1 %vm168_vm8, %v163_v32 }
  0x8a   :  { %v692_v33 = vpop.f32.mrf.mxu0 }
  0x8b   :  { %v694_v34 = vpop.f32.mrf.mxu1  ;;  %v295_v16 = vmul.f32 %v692_v33, %v692_v33 }
  0x8c   :  { %v698_v35 = vmul.f32 %v694_v34, %v692_v33  ;;  %v327_v29 = vmul.f32 %v694_v34, %v694_v34 }
  0x90   :  { %v153_v36 = vpop.f32.mrf.mxu3 }
  0x91   :  { %v306_v37 = vmul.f32 %v153_v36, %v153_v36 }
  0x92   :  { %v123_v38 = vpop.f32.mrf.mxu0 }
  0x93   :  { %v700_v39 = vpop.f32.mrf.mxu1  ;;  %v144_v40 = vpop.f32.mrf.mxu2  ;;  %311 = vmatpush.msra.mxu3 %v306_v37  ;;  %v296_v14 = vmul.f32 %v123_v38, %v123_v38 }
  0x94   :  { %v303_v51 = vmul.f32 %v144_v40, %v144_v40  ;;  %v260_v15 = vmul.f32 %v700_v39, %v123_v38  ;;  %v328_v28 = vmul.f32 %v700_v39, %v700_v39 }
  0x98   :  { %v702_v41 = vpop.f32.mrf.mxu3 }
  0x99   :  { %v267_v61 = vmul.f32 %v702_v41, %v144_v40  ;;  %v335_v21 = vmul.f32 %v702_v41, %v702_v41 }
  0x9a   :  { %v126_v42 = vpop.f32.mrf.mxu0 }
  0x9b   :  { %v704_v43 = vpop.f32.mrf.mxu1  ;;  %v147_v44 = vpop.f32.mrf.mxu2  ;;  %v297_v12 = vmul.f32 %v126_v42, %v126_v42 }
  0x9c   :  { %v304_v49 = vmul.f32 %v147_v44, %v147_v44  ;;  %v261_v13 = vmul.f32 %v704_v43, %v126_v42  ;;  %v329_v27 = vmul.f32 %v704_v43, %v704_v43 }
  0xa0   :  { %v706_v45 = vpop.f32.mrf.mxu3 }
  0xa1   :  { %v268_v60 = vmul.f32 %v706_v45, %v147_v44  ;;  %v336_v20 = vmul.f32 %v706_v45, %v706_v45 }
  0xa2   :  { %v129_v46 = vpop.f32.mrf.mxu0 }
  0xa3   :  { %v708_v47 = vpop.f32.mrf.mxu1  ;;  %v150_v48 = vpop.f32.mrf.mxu2  ;;  %v298_v10 = vmul.f32 %v129_v46, %v129_v46 }
  0xa4   :  { %v305_v50 = vmul.f32 %v150_v48, %v150_v48  ;;  %v262_v11 = vmul.f32 %v708_v47, %v129_v46  ;;  %v330_v26 = vmul.f32 %v708_v47, %v708_v47 }
  0xa6   :  { %312 = vmatpush.msra.mxu3 %v305_v50 }
  0xa8   :  { %v252_v52 = vpop.f32.mrf.mxu3  ;;  %313 = vmatpush.msra.mxu3 %v304_v49 }
  0xa9   :  { %v269_v57 = vmul.f32 %v252_v52, %v150_v48  ;;  %v337_v19 = vmul.f32 %v252_v52, %v252_v52 }
  0xaa   :  { %v132_v53 = vpop.f32.mrf.mxu0  ;;  %314 = vmatpush.msra.mxu3 %v303_v51  ;;  %v383_v51 = vld [vmem:[%s752_s5] sm:$0x1] }
  0xab   :  { %v710_v54 = vpop.f32.mrf.mxu1  ;;  %v299_v8 = vmul.f32 %v132_v53, %v132_v53 }
  0xac   :  { %v263_v9 = vmul.f32 %v710_v54, %v132_v53  ;;  %v331_v25 = vmul.f32 %v710_v54, %v710_v54 }
  0xb0   :  { %v255_v55 = vpop.f32.mrf.mxu3 }
  0xb1   :  { %v270_v56 = vmul.f32 %v255_v55, %v153_v36  ;;  %v338_v18 = vmul.f32 %v255_v55, %v255_v55 }
  0xb2   :  { %v135_v58 = vpop.f32.mrf.mxu0 }
  0xb3   :  { %v237_v59 = vpop.f32.mrf.mxu1  ;;  %279 = vmatpush.msrb.mxu2 %v270_v56  ;;  %v300_v6 = vmul.f32 %v135_v58, %v135_v58 }
  0xb4   :  { %v264_v7 = vmul.f32 %v237_v59, %v135_v58  ;;  %v332_v24 = vmul.f32 %v237_v59, %v237_v59 }
  0xb5   :  { %280 = vmatpush.msrb.mxu2 %v269_v57 }
  0xb7   :  { %281 = vmatpush.msrb.mxu2 %v268_v60 }
  0xb9   :  { %282 = vmatpush.msrb.mxu2 %v267_v61 }
  0xba   :  { %v138_v62 = vpop.f32.mrf.mxu0 }
  0xbb   :  { %v240_v63 = vpop.f32.mrf.mxu1  ;;  %v301_v4 = vmul.f32 %v138_v62, %v138_v62 }
  0xbc   :  { %v265_v5 = vmul.f32 %v240_v63, %v138_v62  ;;  %v333_v23 = vmul.f32 %v240_v63, %v240_v63 }
  0xc2   :  { %v141_v0 = vpop.f32.mrf.mxu0 }
  0xc3   :  { %v302_v1 = vmul.f32 %v141_v0, %v141_v0  ;;  %v243_v2 = vpop.f32.mrf.mxu1 }
  0xc4   :  { %v266_v3 = vmul.f32 %v243_v2, %v141_v0  ;;  %v334_v22 = vmul.f32 %v243_v2, %v243_v2 }
  0xc5   :  { %315 = vmatpush.msra.mxu3 %v302_v1 }
  0xc6   :  { %283 = vmatpush.msrb.mxu2 %v266_v3 }
  0xc7   :  { %316 = vmatpush.msra.mxu3 %v301_v4 }
  0xc8   :  { %284 = vmatpush.msrb.mxu2 %v265_v5 }
  0xc9   :  { %317 = vmatpush.msra.mxu3 %v300_v6 }
  0xca   :  { %285 = vmatpush.msrb.mxu2 %v264_v7 }
  0xcb   :  { %318 = vmatpush.msra.mxu3 %v299_v8 }
  0xcc   :  { %286 = vmatpush.msrb.mxu2 %v263_v9 }
  0xcd   :  { %319 = vmatpush.msra.mxu3 %v298_v10 }
  0xce   :  { %287 = vmatpush.msrb.mxu2 %v262_v11 }
  0xcf   :  { %320 = vmatpush.msra.mxu3 %v297_v12 }
  0xd0   :  { %288 = vmatpush.msrb.mxu2 %v261_v13 }
  0xd1   :  { %321 = vmatpush.msra.mxu3 %v296_v14 }
  0xd2   :  { %289 = vmatpush.msrb.mxu2 %v260_v15 }
  0xd3   :  { %322 = vmatpush.msra.mxu3 %v295_v16 }
  0xd4   :  { %290 = vmatpush.msrb.mxu2 %v698_v35  ;;  %487 = vmatmul.msk.f32.vlgmr.msra.gmra.mxu3 %vm271_vm9, %v258_v17 }
  0xd5   :  { %486 = vmatmul.msk.f32.vlgmr.msrb.gmra.mxu2 %vm271_vm9, %v258_v17 }
  0xd6   :  { %343 = vmatpush.msra.mxu2 %v338_v18 }
  0xd8   :  { %344 = vmatpush.msra.mxu2 %v337_v19 }
  0xda   :  { %345 = vmatpush.msra.mxu2 %v336_v20 }
  0xdc   :  { %346 = vmatpush.msra.mxu2 %v335_v21 }
  0xde   :  { %347 = vmatpush.msra.mxu2 %v334_v22 }
  0xe0   :  { %348 = vmatpush.msra.mxu2 %v333_v23 }
  0xe2   :  { %349 = vmatpush.msra.mxu2 %v332_v24 }
  0xe4   :  { %350 = vmatpush.msra.mxu2 %v331_v25 }
  0xe6   :  { %351 = vmatpush.msra.mxu2 %v330_v26 }
  0xe8   :  { %352 = vmatpush.msra.mxu2 %v329_v27 }
  0xea   :  { %353 = vmatpush.msra.mxu2 %v328_v28 }
  0xec   :  { %354 = vmatpush.msra.mxu2 %v327_v29 }
  0xed   :  { %488 = vmatmul.msk.f32.vlgmr.msra.gmra.mxu2 %vm271_vm9, %v258_v17 }
 0x157   :  { %v324_v30 = vpop.f32.mrf.mxu3 }
 0x158   :  { %506 = vrsqrt.f32 %v324_v30  ;;  %v292_v32 = vpop.f32.mrf.mxu2  ;;  %vm366_vm10 = vweird.f32 %v324_v30  ;;  %vm359_vm13 = vcmp.gt.f32.partialorder %v324_v30, 1.0 }
 0x15e   :  { %v507_v31 = vpop.eup %506 }
 0x15f   :  { %v361_v33 = vmul.f32 %v507_v31, %v324_v30  ;;  %vm367_vm11 = vweird.f32 %v507_v31 }
 0x160   :  { %vm368_vm12 = vmor %vm366_vm10, %vm367_vm11 }
 0x161   :  { %v362_v35 = vmul.f32 %v507_v31, %v361_v33 }
 0x163   :  { %v363_v36 = vmul.f32 0.5, %v362_v35 }
 0x165   :  { %v364_v38 = vsub.f32 1.5, %v363_v36 }
 0x167   :  { %v365_v40 = vmul.f32 %v507_v31, %v364_v38 }
 0x169   :  { %v369_v42 = vsel %vm368_vm12, %v507_v31, %v365_v40 }
 0x16a   :  { %v370_v45 = vsel %vm359_vm13, %v369_v42, 1.0 }
 0x16b   :  { %v384_v47 = vmul.f32 %v370_v45, %v292_v32 }
 0x170   :  { %v356_v37 = vpop.f32.mrf.mxu2 }
 0x171   :  { %508 = vrsqrt.f32 %v356_v37  ;;  %vm378_vm15 = vweird.f32 %v356_v37  ;;  %vm371_vm1 = vcmp.gt.f32.partialorder %v356_v37, 1.0 }
 0x177   :  { %v509_v39 = vpop.eup %508 }
 0x178   :  { %v373_v41 = vmul.f32 %v509_v39, %v356_v37  ;;  %vm379_vm14 = vweird.f32 %v509_v39 }
 0x179   :  { %vm380_vm0 = vmor %vm378_vm15, %vm379_vm14 }
 0x17a   :  { %v374_v34 = vmul.f32 %v509_v39, %v373_v41 }
 0x17c   :  { %v375_v43 = vmul.f32 0.5, %v374_v34 }
 0x17e   :  { %v376_v44 = vsub.f32 1.5, %v375_v43 }
 0x180   :  { %v377_v46 = vmul.f32 %v509_v39, %v376_v44 }
 0x182   :  { %v381_v48 = vsel %vm380_vm0, %v509_v39, %v377_v46 }
 0x183   :  { %v382_v49 = vsel %vm371_vm1, %v381_v48, 1.0 }
 0x184   :  { %v385_v50 = vmul.f32 %v384_v47, %v382_v49 }
 0x186   :  { %489 = vmatpush.msk.msrb.mxu3 %vm390_vm2, %v385_v50 }
 0x187   :  { %490 = vmatmul.msk.f32.vlgmr.msrb.gmra.mxu3 %vm386_vm3, %v383_v51 }
 0x20a   :  { %v411_v52 = vpop.f32.mrf.mxu3 }
 0x20b   :  { %v491_v53 = vmul.f32 -1.442695, %v411_v52 }
 0x20d   :  { %510 = vpow2.f32 %v491_v53 }
 0x213   :  { %v511_v54 = vpop.eup %510 }
 0x214   :  { %v417_v55 = vadd.f32 1.0, %v511_v54 }
 0x216   :  { %512 = vrcp.f32 %v417_v55  ;;  %v429_v59 = vand.u32 2147483648, %v417_v55  ;;  %v427_v61 = vand.u32 2147483647, %v417_v55  ;;  %vm423_vm5 = vweird.f32 %v417_v55 }
 0x218   :  { %v430_v63 = vor.u32 1.1754944e-38, %v429_v59  ;;  %vm428_vm7 = vcmp.eq.f32.partialorder %v427_v61, 8.507059e+37 }
 0x21c   :  { %v513_v56 = vpop.eup %512 }
 0x21d   :  { %v419_v57 = vmul.f32 %v513_v56, %v417_v55  ;;  %vm424_vm4 = vweird.f32 %v513_v56 }
 0x21e   :  { %vm425_vm6 = vmor %vm423_vm5, %vm424_vm4 }
 0x21f   :  { %v420_v58 = vsub.f32 1.0, %v419_v57 }
 0x221   :  { %v421_v60 = vmul.f32 %v513_v56, %v420_v58 }
 0x223   :  { %v422_v62 = vadd.f32 %v513_v56, %v421_v60 }
 0x225   :  { %v426_v0 = vsel %vm425_vm6, %v513_v56, %v422_v62 }
 0x226   :  { %v431_v1 = vsel %vm428_vm7, %v430_v63, %v426_v0 }
 0x227   :  { %433 = vst [vmem:[#allocation2] sm:$0x1] %v431_v1 }
 0x228   :  { %444 = dma.vmem_to_hbm [thread:$0]  %s440_s23, 16, %s442_s0, [#allocation3]  }
 0x229   :  { %538 = dma.done.wait [#allocation3], 16  }
 0x22a   :  { %539 = vsyncadd [#allocation3], 4294967280 }
 0x22b   :  { %449 = vsyncpa [#allocation3], 1 }

</bundles_post_ra>
